<compile_context>
chip_gen: v5e
topology: v5e:2x2
jax: 0.10.0
libtpu: 0.0.40
codegen_flags: <defaults>
</compile_context>

<pallas_src>
import jax
import jax.numpy as jnp
from jax.experimental import pallas as pl
from jax.experimental.pallas import tpu as pltpu


_TARGET_TILE_BYTES = 4 * 1024 * 1024   # padded-footprint budget per input tile
_LANE = 128
_MIN_VMEM_LIMIT = 16 * 1024 * 1024
_MAX_VMEM_LIMIT = 48 * 1024 * 1024


def _round_up(a, b):
    return -(-a // b) * b


def _sublane_multiple(itemsize):
    # Native VMEM tiles: (8,128) for 4-byte, (16,128) for 2-byte, (32,128) for
    # 1-byte dtypes.
    return {4: 8, 2: 16, 1: 32}.get(itemsize, 8)


def _make_argmax_kernel(n, tn, dtype, needs_tail_mask, single_chunk):
    is_float = jnp.issubdtype(dtype, jnp.floating)
    if is_float:
        fill = float("-inf")
    elif jnp.issubdtype(dtype, jnp.integer):
        fill = int(jnp.iinfo(dtype).min)
    else:
        fill = 0

    def kernel(x_ref, o_ref, *scratch):
        x = x_ref[...]
        # Local (1, tn) lane iota; broadcast into the selects instead of
        # materializing a full-tile global-index array per chunk.
        col = jax.lax.broadcasted_iota(jnp.int32, (1, tn), 1)

        if single_chunk:
            # Whole reduction axis in one block: write the result directly.
            cmax = jnp.max(x, axis=-1, keepdims=True)
            hit = x == cmax
            if is_float:
                hit = hit | jnp.isnan(x)         # NaN is "maximal" (torch)
            o_ref[...] = jnp.min(jnp.where(hit, col, jnp.int32(tn)),
                                 axis=-1, keepdims=True)
            return

        run_max_ref, run_idx_ref = scratch
        k = pl.program_id(1)

        if needs_tail_mask:
            # Last N-chunk may run past the array; neutralize the tail so
            # garbage columns can never win.  The compare is against a scalar
            # (valid >= tn on all non-tail chunks).
            valid = jnp.int32(n) - k * jnp.int32(tn)
            x = jnp.where(col < valid, x, jnp.asarray(fill, dtype))

        # Per-chunk max (NaN-propagating) + first-occurrence argmax.
        cmax = jnp.max(x, axis=-1, keepdims=True)
        hit = x == cmax
        if is_float:
            hit = hit | jnp.isnan(x)             # NaN is "maximal" (torch)
        cidx = jnp.min(jnp.where(hit, col, jnp.int32(tn)),
                       axis=-1, keepdims=True) + k * jnp.int32(tn)

        @pl.when(k == 0)
        def _():
            run_max_ref[...] = cmax
            run_idx_ref[...] = cidx

        @pl.when(k > 0)
        def _():
            prev_max = run_max_ref[...]
            prev_idx = run_idx_ref[...]
            take = cmax > prev_max
            if is_float:
                # A new NaN only wins if no earlier chunk already had one
                # (first-NaN semantics); ties keep the earlier index.
                take = take | (jnp.isnan(cmax) & ~jnp.isnan(prev_max))
            run_max_ref[...] = jnp.where(take, cmax, prev_max)
            run_idx_ref[...] = jnp.where(take, cidx, prev_idx)

        @pl.when(k == pl.num_programs(1) - 1)
        def _():
            o_ref[...] = run_idx_ref[...]

    return kernel


def argmax_last_dim(x, *, block_rows=None, block_cols=None):
    """torch.argmax(x, dim=-1): int32 indices with the leading shape of x."""
    lead = x.shape[:-1]
    n = x.shape[-1]
    m = 1
    for d in lead:
        m *= d
    x2 = x.reshape(m, n)
    itemsize = x2.dtype.itemsize
    sub = _sublane_multiple(itemsize)

    # ---- reduction-axis (lane) chunk ---------------------------------------
    padded_n = _round_up(n, _LANE)
    if block_cols is not None:
        tn = min(int(block_cols), n)
    elif padded_n * itemsize * sub <= _TARGET_TILE_BYTES:
        tn = n                                   # whole axis in one chunk
    else:
        # Large-N path: moderate lane chunk (<=4K cols); prefer a 128-multiple
        # divisor of n so no tail masking is needed.
        tn_cap = max(512, min(4096,
                              (_TARGET_TILE_BYTES // (256 * itemsize))
                              // _LANE * _LANE))
        tn = tn_cap
        best = 0
        d = _LANE
        while d <= tn_cap:
            if n % d == 0:
                best = d
            d += _LANE
        if best >= max(_LANE, tn_cap // 4):
            tn = best

    single_chunk = tn >= n
    if single_chunk:
        tn = n
    needs_tail_mask = (n % tn) != 0
    padded_tn = _round_up(tn, _LANE)

    # ---- row (sublane) tile, sized on the *lane-padded* VMEM footprint ------
    # per-row bytes: padded input row + padded int32 output row
    # (+ the (tm,1) accumulators for the multi-chunk path).
    row_bytes = padded_tn * itemsize + _LANE * 4
    if not single_chunk:
        row_bytes += _LANE * (itemsize + 4)

    if block_rows is not None:
        tm = min(max(1, int(block_rows)), m)
    else:
        tm = max(sub, (_TARGET_TILE_BYTES // row_bytes) // sub * sub)
        if not single_chunk:
            tm = min(tm, 256)     # rebalanced large-N tiles: wide tn, tm <= 256
        if tm >= m:
            tm = m
            # Megacore (v7x has 2 TCs): keep >= 2 row blocks when splitting
            # still leaves reasonably sized (~>=1 MiB) tiles.
            half_rows = _round_up(-(-m // 2), sub)
            if half_rows < m and half_rows * row_bytes >= (1 << 20):
                tm = half_rows

    grid = (pl.cdiv(m, tm), pl.cdiv(n, tn))

    kernel = _make_argmax_kernel(n=n, tn=tn, dtype=x2.dtype,
                                 needs_tail_mask=needs_tail_mask,
                                 single_chunk=single_chunk)

    scratch_shapes = []
    if not single_chunk:
        scratch_shapes = [pltpu.VMEM((tm, 1), x2.dtype),    # running max
                          pltpu.VMEM((tm, 1), jnp.int32)]   # running argmax

    # VMEM limit from the actual (lane-padded) footprint: double-buffered input
    # and output blocks, accumulators, plus headroom for tile-sized temporaries.
    in_buf = tm * padded_tn * itemsize
    out_buf = tm * _LANE * 4
    acc_buf = 0 if single_chunk else tm * _LANE * (itemsize + 4)
    temps = 2 * tm * padded_tn * 4
    vmem_limit = 2 * in_buf + 2 * out_buf + acc_buf + temps + (2 << 20)
    vmem_limit = int(min(max(vmem_limit, _MIN_VMEM_LIMIT), _MAX_VMEM_LIMIT))

    out = pl.pallas_call(
        kernel,
        out_shape=jax.ShapeDtypeStruct((m, 1), jnp.int32),
        grid_spec=pltpu.PrefetchScalarGridSpec(
            num_scalar_prefetch=0,
            grid=grid,
            in_specs=[pl.BlockSpec((tm, tn), lambda i, k: (i, k))],
            out_specs=pl.BlockSpec((tm, 1), lambda i, k: (i, 0)),
            scratch_shapes=scratch_shapes,
        ),
        compiler_params=pltpu.CompilerParams(
            dimension_semantics=("parallel", "arbitrary"),
            vmem_limit_bytes=vmem_limit,
        ),
    )(x2)

    return out.reshape(lead)


if __name__ == "__main__":
    key = jax.random.PRNGKey(0)

    # 1) Basic case consistent with an arbitrary-rank input to Argmax.forward.
    x = jax.random.normal(key, (2, 4, 16, 16), dtype=jnp.float32)
    y = jax.block_until_ready(argmax_last_dim(x))
    y_ref = jnp.argmax(x, axis=-1).astype(jnp.int32)
    assert y.shape == y_ref.shape, (y.shape, y_ref.shape)
    assert bool(jnp.all(y == y_ref)), "argmax mismatch (basic)"

    # 2) Exercise the N-tiled reduction path + ragged row/column tails
    #    (forced small blocks so the multi-chunk accumulator code runs).
    k2 = jax.random.PRNGKey(1)
    x2 = jax.random.normal(k2, (20, 300), dtype=jnp.float32)
    y2 = jax.block_until_ready(argmax_last_dim(x2, block_rows=8, block_cols=128))
    y2_ref = jnp.argmax(x2, axis=-1).astype(jnp.int32)
    assert bool(jnp.all(y2 == y2_ref)), "argmax mismatch (tiled)"

    # 3) NaN semantics: torch.argmax returns the index of the (first) NaN.
    x3 = x2.at[3, 57].set(jnp.nan)
    y3 = jax.block_until_ready(argmax_last_dim(x3, block_rows=8, block_cols=128))
    assert int(y3[3]) == 57, "NaN handling mismatch"

    # 4) bf16 input (dtype-aware sublane rounding path).
    k4 = jax.random.PRNGKey(2)
    x4 = jax.random.normal(k4, (4, 64, 33), dtype=jnp.bfloat16)
    y4 = jax.block_until_ready(argmax_last_dim(x4))
    y4_ref = jnp.argmax(x4, axis=-1).astype(jnp.int32)
    assert bool(jnp.all(y4 == y4_ref)), "argmax mismatch (bf16)"

    print("KERNEL_OK")
</pallas_src>

<mosaic_0001>
module attributes {stable_mosaic.version = 11 : i64} {
  func.func @kernel(%arg0: i32, %arg1: i32, %arg2: memref<128x16xf32, #tpu.memory_space<vmem>>, %arg3: memref<128x1xi32, #tpu.memory_space<vmem>>) attributes {dimension_semantics = [#tpu.dimension_semantics<parallel>, #tpu.dimension_semantics<arbitrary>], iteration_bounds = array<i64: 1, 1>, scalar_prefetch = 0 : i64, scratch_operands = 0 : i64, tpu.core_type = #tpu.core_type<tc>, window_params = [{transform_indices = @transform_0, window_bounds = array<i64: 128, 16>}, {transform_indices = @transform_1, window_bounds = array<i64: 128, 1>}]} {
    %c0 = arith.constant 0 : index
    %c0_0 = arith.constant 0 : index
    %0 = vector.load %arg2[%c0, %c0_0] : memref<128x16xf32, #tpu.memory_space<vmem>>, vector<128x16xf32>
    %1 = tpu.iota {dimensions = array<i32: 1>} : vector<1x16xi32>
    %cst = arith.constant dense<0xFF800000> : vector<128xf32>
    %2 = vector.multi_reduction <maximumf>, %0, %cst [1] : vector<128x16xf32> to vector<128xf32>
    %3 = vector.shape_cast %2 : vector<128xf32> to vector<128x1xf32>
    %4 = vector.broadcast %3 : vector<128x1xf32> to vector<128x16xf32>
    %5 = arith.cmpf oeq, %0, %4 : vector<128x16xf32>
    %6 = arith.cmpf one, %0, %0 : vector<128x16xf32>
    %7 = arith.ori %5, %6 : vector<128x16xi1>
    %c16_i32 = arith.constant 16 : i32
    %8 = vector.shape_cast %1 : vector<1x16xi32> to vector<1x16xi32>
    %9 = vector.broadcast %8 : vector<1x16xi32> to vector<128x16xi32>
    %10 = vector.broadcast %c16_i32 : i32 to vector<128x16xi32>
    %11 = arith.select %7, %9, %10 : vector<128x16xi1>, vector<128x16xi32>
    %cst_1 = arith.constant dense<2147483647> : vector<128xi32>
    %12 = vector.multi_reduction <minsi>, %11, %cst_1 [1] : vector<128x16xi32> to vector<128xi32>
    %13 = vector.shape_cast %12 : vector<128xi32> to vector<128x1xi32>
    %c0_2 = arith.constant 0 : index
    %c0_3 = arith.constant 0 : index
    %14 = vector.load %arg3[%c0_2, %c0_3] : memref<128x1xi32, #tpu.memory_space<vmem>>, vector<128x1xi32>
    tpu.vector_store %arg3[%c0_2, %c0_3], %13 {strides = array<i32>} : memref<128x1xi32, #tpu.memory_space<vmem>>, vector<128x1xi32>,
    return
  }
  func.func @transform_0(%arg0: i32, %arg1: i32) -> (i32, i32) {
    %c0_i32 = arith.constant 0 : i32
    return %arg0, %arg1 : i32, i32
  }
  func.func @transform_1(%arg0: i32, %arg1: i32) -> (i32, i32) {
    %c0_i32 = arith.constant 0 : i32
    %c0_i32_0 = arith.constant 0 : i32
    return %arg0, %c0_i32 : i32, i32
  }
}

</mosaic_0001>

<bundles_post_ra>
// kernel: tpu_custom_call.1
= control target key start
LH: loop header
LB: loop body
LE: loop exit
PB: predicated region body
PF: predicated region fallthrough
CT: control target
= control target key end

     0   :  { %vm26_vm0 = vcmask 130048   ;;  %v24_v32 = vlaneseq  ;;  %s854_s0 = inlined_call_operand.vmem [shape: f32[128,16], index: 0, kind: input, shape index: {}]   ;;  %s855_s1 = inlined_call_operand.vmem [shape: s32[128,1], index: 1, kind: output, shape index: {}]  }
   0x1   :  { %v12_v0 = vld [vmem:[%s854_s0 + $0x20] sm:$0xff]  ;;  %v10_v1 = vld [vmem:[%s854_s0 + $0x10] sm:$0xff]  ;;  %v425_v6 = vld [vmem:[%s854_s0 + $0x28] sm:$0xff] }
   0x2   :  { %v8_v2 = vld [vmem:[%s854_s0] sm:$0xff]  ;;  %v39_v3 = vsel %vm26_vm0, %v12_v0, -inf  ;;  %v33_v4 = vsel %vm26_vm0, %v10_v1, -inf  ;;  %v430_v7 = vld [vmem:[%s854_s0 + $0x18] sm:$0xff]  ;;  %v435_v8 = vld [vmem:[%s854_s0 + $0x8] sm:$0xff]  ;;  %v42_v9 = vsel %vm26_vm0, %v425_v6, -inf  ;;  %vm95_vm1 = vcmp.ne.f32.partialorder %v12_v0, %v12_v0 }
   0x3   :  { %v27_v5 = vsel %vm26_vm0, %v8_v2, -inf  ;;  %40 = vmax.xlane.f32.xlu2 %v39_v3  ;;  %34 = vmax.xlane.f32.xlu1 %v33_v4  ;;  %v36_v10 = vsel %vm26_vm0, %v430_v7, -inf  ;;  %v30_v11 = vsel %vm26_vm0, %v435_v8, -inf  ;;  %v446_v12 = vld [vmem:[%s854_s0 + $0x40] sm:$0xff]  ;;  %v451_v13 = vld [vmem:[%s854_s0 + $0x38] sm:$0xff]  ;;  %v456_v14 = vld [vmem:[%s854_s0 + $0x30] sm:$0xff]  ;;  %vm93_vm2 = vcmp.ne.f32.partialorder %v10_v1, %v10_v1 }
   0x4   :  { %28 = vmax.xlane.f32.xlu0 %v27_v5  ;;  %v51_v15 = vsel %vm26_vm0, %v446_v12, -inf  ;;  %v48_v16 = vsel %vm26_vm0, %v451_v13, -inf  ;;  %v45_v17 = vsel %vm26_vm0, %v456_v14, -inf  ;;  %v467_v18 = vld [vmem:[%s854_s0 + $0x58] sm:$0xff]  ;;  %v472_v19 = vld [vmem:[%s854_s0 + $0x50] sm:$0xff]  ;;  %v477_v20 = vld [vmem:[%s854_s0 + $0x48] sm:$0xff]  ;;  %vm91_vm5 = vcmp.ne.f32.partialorder %v8_v2, %v8_v2 }
   0x5   :  { %v60_v21 = vsel %vm26_vm0, %v467_v18, -inf  ;;  %v57_v22 = vsel %vm26_vm0, %v472_v19, -inf  ;;  %v54_v23 = vsel %vm26_vm0, %v477_v20, -inf  ;;  %v488_v24 = vld [vmem:[%s854_s0 + $0x70] sm:$0xff]  ;;  %v493_v25 = vld [vmem:[%s854_s0 + $0x68] sm:$0xff]  ;;  %v498_v26 = vld [vmem:[%s854_s0 + $0x60] sm:$0xff]  ;;  %vm96_vm10 = vcmp.ne.f32.partialorder %v425_v6, %v425_v6 }
   0x6   :  { %v69_v27 = vsel %vm26_vm0, %v488_v24, -inf  ;;  %v66_v28 = vsel %vm26_vm0, %v493_v25, -inf  ;;  %v63_v29 = vsel %vm26_vm0, %v498_v26, -inf  ;;  %v509_v30 = vld [vmem:[%s854_s0 + $0x78] sm:$0xff]  ;;  %v513_v33 = vand.u32 127, %v24_v32 }
   0x7   :  { %v72_v31 = vsel %vm26_vm0, %v509_v30, -inf  ;;  %vm94_vm11 = vcmp.ne.f32.partialorder %v430_v7, %v430_v7  ;;  %vm92_vm14 = vcmp.ne.f32.partialorder %v435_v8, %v435_v8 }
   0xb   :  { %43 = vmax.xlane.f32.xlu2 %v42_v9  ;;  %37 = vmax.xlane.f32.xlu1 %v36_v10 }
   0xc   :  { %31 = vmax.xlane.f32.xlu0 %v30_v11 }
  0x13   :  { %52 = vmax.xlane.f32.xlu2 %v51_v15  ;;  %49 = vmax.xlane.f32.xlu1 %v48_v16 }
  0x14   :  { %46 = vmax.xlane.f32.xlu0 %v45_v17 }
  0x1b   :  { %61 = vmax.xlane.f32.xlu2 %v60_v21  ;;  %58 = vmax.xlane.f32.xlu1 %v57_v22 }
  0x1c   :  { %55 = vmax.xlane.f32.xlu0 %v54_v23 }
  0x23   :  { %70 = vmax.xlane.f32.xlu2 %v69_v27  ;;  %67 = vmax.xlane.f32.xlu1 %v66_v28 }
  0x24   :  { %64 = vmax.xlane.f32.xlu0 %v63_v29 }
  0x2c   :  { %73 = vmax.xlane.f32.xlu0 %v72_v31 }
  0x76   :  { %v41_v34 = vpop.xlane.xlu2 %40  ;;  %v35_v35 = vpop.xlane.xlu1 %34 }
  0x77   :  { %vm79_vm3 = vcmp.eq.f32.partialorder %v12_v0, %v41_v34  ;;  %vm77_vm4 = vcmp.eq.f32.partialorder %v10_v1, %v35_v35  ;;  %v29_v36 = vpop.xlane.xlu0 %28 }
  0x78   :  { %vm515_vm6 = vmor %vm79_vm3, %vm95_vm1  ;;  %vm75_vm7 = vcmp.eq.f32.partialorder %v8_v2, %v29_v36 }
  0x79   :  { %vm109_vm8 = vmor %vm77_vm4, %vm93_vm2  ;;  %v127_v39 = vsel %vm515_vm6, %v513_v33, 16  ;;  %vm99_vm4 = vcmp.ne.f32.partialorder %v446_v12, %v446_v12 }
  0x7a   :  { %v125_v38 = vsel %vm109_vm8, %v513_v33, 16  ;;  %vm107_vm9 = vmor %vm75_vm7, %vm91_vm5  ;;  %v539_v48 = vsel %vm26_vm0, %v127_v39, 2147483647  ;;  %vm98_vm5 = vcmp.ne.f32.partialorder %v451_v13, %v451_v13  ;;  %vm97_vm8 = vcmp.ne.f32.partialorder %v456_v14, %v456_v14 }
  0x7b   :  { %v123_v40 = vsel %vm107_vm9, %v513_v33, 16  ;;  %v525_v41 = vsel %vm26_vm0, %v125_v38, 2147483647  ;;  %v201_v53 = vshra.s32 %v539_v48, 16 }
  0x7c   :  { %v171_v42 = vshra.s32 %v525_v41, 16  ;;  %v529_v43 = vsel %vm26_vm0, %v123_v40, 2147483647 }
  0x7d   :  { %v141_v44 = vshra.s32 %v529_v43, 16  ;;  %v571_v60 = vcvt.s32.f32 %v201_v53 }
  0x7e   :  { %v44_v45 = vpop.xlane.xlu2 %43  ;;  %v38_v46 = vpop.xlane.xlu1 %37  ;;  %v536_v47 = vcvt.s32.f32 %v171_v42 }
  0x7f   :  { %vm80_vm12 = vcmp.eq.f32.partialorder %v425_v6, %v44_v45  ;;  %vm78_vm13 = vcmp.eq.f32.partialorder %v430_v7, %v38_v46  ;;  %v32_v49 = vpop.xlane.xlu0 %31  ;;  %v545_v50 = vcvt.s32.f32 %v141_v44 }
  0x80   :  { %vm112_vm15 = vmor %vm80_vm12, %vm96_vm10  ;;  %vm76_vm1 = vcmp.eq.f32.partialorder %v435_v8, %v32_v49  ;;  %174 = vmin.xlane.f32.xlu2 %v536_v47 }
  0x81   :  { %v128_v51 = vsel %vm112_vm15, %v513_v33, 16  ;;  %vm550_vm2 = vmor %vm78_vm13, %vm94_vm11  ;;  %144 = vmin.xlane.f32.xlu1 %v545_v50  ;;  %vm102_vm13 = vcmp.ne.f32.partialorder %v467_v18, %v467_v18 }
  0x82   :  { %vm108_vm3 = vmor %vm76_vm1, %vm92_vm14  ;;  %v557_v54 = vsel %vm26_vm0, %v128_v51, 2147483647  ;;  %v126_v55 = vsel %vm550_vm2, %v513_v33, 16  ;;  %vm101_vm14 = vcmp.ne.f32.partialorder %v472_v19, %v472_v19  ;;  %vm100_vm2 = vcmp.ne.f32.partialorder %v477_v20, %v477_v20 }
  0x83   :  { %v124_v56 = vsel %vm108_vm3, %v513_v33, 16  ;;  %v216_v57 = vshra.s32 %v557_v54, 16  ;;  %v577_v0 = vsel %vm26_vm0, %v126_v55, 2147483647 }
  0x84   :  { %v565_v58 = vsel %vm26_vm0, %v124_v56, 2147483647  ;;  %v186_v4 = vshra.s32 %v577_v0, 16 }
  0x85   :  { %v569_v59 = vcvt.s32.f32 %v216_v57  ;;  %v156_v61 = vshra.s32 %v565_v58, 16 }
  0x86   :  { %v53_v62 = vpop.xlane.xlu2 %52  ;;  %v50_v63 = vpop.xlane.xlu1 %49 }
  0x87   :  { %vm83_vm6 = vcmp.eq.f32.partialorder %v446_v12, %v53_v62  ;;  %vm82_vm7 = vcmp.eq.f32.partialorder %v451_v13, %v50_v63  ;;  %v581_v1 = vcvt.s32.f32 %v156_v61  ;;  %v47_v2 = vpop.xlane.xlu0 %46  ;;  %v605_v12 = vcvt.s32.f32 %v186_v4 }
  0x88   :  { %vm115_vm9 = vmor %vm83_vm6, %vm99_vm4  ;;  %219 = vmin.xlane.f32.xlu2 %v569_v59  ;;  %vm81_vm10 = vcmp.eq.f32.partialorder %v456_v14, %v47_v2  ;;  %v200_v4 = vand.u32 65535, %v539_v48 }
  0x89   :  { %v131_v3 = vsel %vm115_vm9, %v513_v33, 16  ;;  %vm114_vm11 = vmor %vm82_vm7, %vm98_vm5  ;;  %204 = vmin.xlane.f32.xlu1 %v571_v60  ;;  %159 = vmin.xlane.f32.xlu0 %v581_v1  ;;  %vm105_vm7 = vcmp.ne.f32.partialorder %v488_v24, %v488_v24 }
  0x8a   :  { %v130_v5 = vsel %vm114_vm11, %v513_v33, 16  ;;  %vm113_vm12 = vmor %vm81_vm10, %vm97_vm8  ;;  %v593_v6 = vsel %vm26_vm0, %v131_v3, 2147483647  ;;  %vm104_vm8 = vcmp.ne.f32.partialorder %v493_v25, %v493_v25  ;;  %vm103_vm11 = vcmp.ne.f32.partialorder %v498_v26, %v498_v26 }
  0x8b   :  { %v129_v7 = vsel %vm113_vm12, %v513_v33, 16  ;;  %v261_v8 = vshra.s32 %v593_v6, 16  ;;  %v598_v9 = vsel %vm26_vm0, %v130_v5, 2147483647  ;;  %v155_v5 = vand.u32 65535, %v565_v58 }
  0x8c   :  { %v246_v10 = vshra.s32 %v598_v9, 16  ;;  %v612_v16 = vsel %vm26_vm0, %v129_v7, 2147483647  ;;  %v245_v48 = vand.u32 65535, %v598_v9  ;;  %v170_v58 = vand.u32 65535, %v525_v41 }
  0x8d   :  { %v603_v11 = vcvt.s32.f32 %v261_v8 }
  0x8e   :  { %v62_v13 = vpop.xlane.xlu2 %61  ;;  %v59_v14 = vpop.xlane.xlu1 %58  ;;  %v609_v15 = vcvt.s32.f32 %v246_v10  ;;  %v202_v10 = vcvt.s32.f32 %v200_v4 }
  0x8f   :  { %vm86_vm15 = vcmp.eq.f32.partialorder %v467_v18, %v62_v13  ;;  %vm85_vm1 = vcmp.eq.f32.partialorder %v472_v19, %v59_v14  ;;  %v56_v17 = vpop.xlane.xlu0 %55  ;;  %v231_v18 = vshra.s32 %v612_v16, 16  ;;  %v185_v14 = vand.u32 65535, %v577_v0 }
  0x90   :  { %vm118_vm3 = vmor %vm86_vm15, %vm102_vm13  ;;  %264 = vmin.xlane.f32.xlu2 %v603_v11  ;;  %vm84_vm4 = vcmp.eq.f32.partialorder %v477_v20, %v56_v17 }
  0x91   :  { %v134_v21 = vsel %vm118_vm3, %v513_v33, 16  ;;  %vm117_vm5 = vmor %vm85_vm1, %vm101_vm14  ;;  %249 = vmin.xlane.f32.xlu1 %v609_v15  ;;  %189 = vmin.xlane.f32.xlu0 %v605_v12  ;;  %v638_v31 = vcvt.s32.f32 %v231_v18  ;;  %vm106_vm1 = vcmp.ne.f32.partialorder %v509_v30, %v509_v30  ;;  %v172_v18 = vcvt.s32.f32 %v170_v58 }
  0x92   :  { %v133_v19 = vsel %vm117_vm5, %v513_v33, 16  ;;  %vm116_vm6 = vmor %vm84_vm4, %vm100_vm2  ;;  %v626_v22 = vsel %vm26_vm0, %v134_v21, 2147483647 }
  0x93   :  { %v132_v23 = vsel %vm116_vm6, %v513_v33, 16  ;;  %v306_v27 = vshra.s32 %v626_v22, 16  ;;  %v631_v20 = vsel %vm26_vm0, %v133_v19, 2147483647  ;;  %v187_v19 = vcvt.s32.f32 %v185_v14 }
  0x94   :  { %v291_v28 = vshra.s32 %v631_v20, 16  ;;  %v645_v36 = vsel %vm26_vm0, %v132_v23, 2147483647  ;;  %v215_v23 = vand.u32 65535, %v557_v54 }
  0x95   :  { %v636_v29 = vcvt.s32.f32 %v306_v27  ;;  %v230_v27 = vand.u32 65535, %v612_v16 }
  0x96   :  { %v71_v32 = vpop.xlane.xlu2 %70  ;;  %v68_v34 = vpop.xlane.xlu1 %67  ;;  %v642_v35 = vcvt.s32.f32 %v291_v28 }
  0x97   :  { %vm89_vm9 = vcmp.eq.f32.partialorder %v488_v24, %v71_v32  ;;  %vm88_vm10 = vcmp.eq.f32.partialorder %v493_v25, %v68_v34  ;;  %v65_v37 = vpop.xlane.xlu0 %64  ;;  %v276_v24 = vshra.s32 %v645_v36, 16  ;;  %v217_v34 = vcvt.s32.f32 %v215_v23 }
  0x98   :  { %vm121_vm12 = vmor %vm89_vm9, %vm105_vm7  ;;  %309 = vmin.xlane.f32.xlu2 %v636_v29  ;;  %vm87_vm13 = vcmp.eq.f32.partialorder %v498_v26, %v65_v37  ;;  %v232_v37 = vcvt.s32.f32 %v230_v27 }
  0x99   :  { %v137_v38 = vsel %vm121_vm12, %v513_v33, 16  ;;  %vm120_vm14 = vmor %vm88_vm10, %vm104_vm8  ;;  %294 = vmin.xlane.f32.xlu1 %v642_v35  ;;  %234 = vmin.xlane.f32.xlu0 %v638_v31  ;;  %v669_v46 = vcvt.s32.f32 %v276_v24  ;;  %v275_v24 = vand.u32 65535, %v645_v36 }
  0x9a   :  { %v136_v25 = vsel %vm120_vm14, %v513_v33, 16  ;;  %vm119_vm15 = vmor %vm87_vm13, %vm103_vm11  ;;  %v659_v39 = vsel %vm26_vm0, %v137_v38, 2147483647  ;;  %v260_v38 = vand.u32 65535, %v593_v6 }
  0x9b   :  { %v135_v40 = vsel %vm119_vm15, %v513_v33, 16  ;;  %v351_v42 = vshra.s32 %v659_v39, 16  ;;  %v664_v26 = vsel %vm26_vm0, %v136_v25, 2147483647 }
  0x9c   :  { %v336_v44 = vshra.s32 %v664_v26, 16  ;;  %v676_v51 = vsel %vm26_vm0, %v135_v40, 2147483647  ;;  %v262_v40 = vcvt.s32.f32 %v260_v38 }
  0x9d   :  { %v667_v45 = vcvt.s32.f32 %v351_v42  ;;  %v321_v53 = vshra.s32 %v676_v51, 16  ;;  %v277_v42 = vcvt.s32.f32 %v275_v24 }
  0x9e   :  { %v671_v49 = vcvt.s32.f32 %v336_v44 }
  0x9f   :  { %v74_v52 = vpop.xlane.xlu0 %73  ;;  %v684_v56 = vcvt.s32.f32 %v321_v53 }
  0xa0   :  { %354 = vmin.xlane.f32.xlu2 %v667_v45  ;;  %vm90_vm2 = vcmp.eq.f32.partialorder %v509_v30, %v74_v52  ;;  %v140_v30 = vand.u32 65535, %v529_v43  ;;  %v157_v43 = vcvt.s32.f32 %v155_v5  ;;  %v320_v52 = vand.u32 65535, %v676_v51 }
  0xa1   :  { %339 = vmin.xlane.f32.xlu1 %v671_v49  ;;  %279 = vmin.xlane.f32.xlu0 %v669_v46  ;;  %vm122_vm3 = vmor %vm90_vm2, %vm106_vm1 }
  0xa2   :  { %v138_v55 = vsel %vm122_vm3, %v513_v33, 16  ;;  %v142_v2 = vcvt.s32.f32 %v140_v30 }
  0xa3   :  { %v687_v57 = vsel %vm26_vm0, %v138_v55, 2147483647  ;;  %v322_v55 = vcvt.s32.f32 %v320_v52 }
  0xa4   :  { %v366_v61 = vshra.s32 %v687_v57, 16  ;;  %v365_v51 = vand.u32 65535, %v687_v57 }
  0xa6   :  { %v691_v62 = vcvt.s32.f32 %v366_v61 }
  0xa9   :  { %324 = vmin.xlane.f32.xlu0 %v684_v56 }
  0xb1   :  { %369 = vmin.xlane.f32.xlu0 %v691_v62 }
  0xf3   :  { %v699_v3 = vpop.xlane.xlu2 %174 }
  0xf4   :  { %v695_v63 = vpop.xlane.xlu1 %144  ;;  %vm176_vm6 = vcmp.eq.f32.partialorder %v536_v47, %v699_v3  ;;  %v290_v47 = vand.u32 65535, %v631_v20 }
  0xf5   :  { %vm146_vm4 = vcmp.eq.f32.partialorder %v545_v50, %v695_v63  ;;  %v177_v0 = vsel %vm176_vm6, %v172_v18, inf  ;;  %v151_v5 = vcvt.f32.s32 %v695_v63 }
  0xf6   :  { %v147_v33 = vsel %vm146_vm4, %v142_v2, inf  ;;  %v292_v32 = vcvt.s32.f32 %v290_v47  ;;  %vm379_vm4 = vcmask 7168  }
  0xf7   :  { %148 = vmin.xlane.f32.xlu2 %v147_v33  ;;  %v367_v33 = vcvt.s32.f32 %v365_v51 }
  0xfb   :  { %v714_v17 = vpop.xlane.xlu2 %219 }
  0xfc   :  { %v703_v7 = vpop.xlane.xlu1 %204  ;;  %v705_v8 = vpop.xlane.xlu0 %159  ;;  %vm221_vm9 = vcmp.eq.f32.partialorder %v569_v59, %v714_v17  ;;  %v335_v59 = vand.u32 65535, %v664_v26 }
  0xfd   :  { %vm206_vm0 = vcmp.eq.f32.partialorder %v571_v60, %v703_v7  ;;  %vm161_vm5 = vcmp.eq.f32.partialorder %v581_v1, %v705_v8  ;;  %v247_v1 = vcvt.s32.f32 %v245_v48  ;;  %v222_v16 = vsel %vm221_vm9, %v217_v34, inf }
  0xfe   :  { %v207_v50 = vsel %vm206_vm0, %v202_v10, inf  ;;  %v162_v13 = vsel %vm161_vm5, %v157_v43, inf }
  0xff   :  { %208 = vmin.xlane.f32.xlu0 %v207_v50  ;;  %163 = vmin.xlane.f32.xlu1 %v162_v13  ;;  %v166_v50 = vcvt.f32.s32 %v705_v8 }
 0x101   :  { %v167_v58 = vshll.u32 %v166_v50, 16 }
 0x103   :  { %v729_v28 = vpop.xlane.xlu2 %264 }
 0x104   :  { %v718_v21 = vpop.xlane.xlu1 %249  ;;  %v720_v60 = vpop.xlane.xlu0 %189  ;;  %vm266_vm12 = vcmp.eq.f32.partialorder %v603_v11, %v729_v28  ;;  %v305_v11 = vand.u32 65535, %v626_v22  ;;  %v350_v22 = vand.u32 65535, %v659_v39  ;;  %v152_v39 = vshll.u32 %v151_v5, 16 }
 0x105   :  { %vm251_vm7 = vcmp.eq.f32.partialorder %v609_v15, %v718_v21  ;;  %vm191_vm8 = vcmp.eq.f32.partialorder %v605_v12, %v720_v60  ;;  %v267_v36 = vsel %vm266_vm12, %v262_v40, inf }
 0x106   :  { %v252_v41 = vsel %vm251_vm7, %v247_v1, inf  ;;  %v192_v9 = vsel %vm191_vm8, %v187_v19, inf  ;;  %v352_v2 = vcvt.s32.f32 %v350_v22  ;;  %v181_v19 = vcvt.f32.s32 %v699_v3 }
 0x107   :  { %253 = vmin.xlane.f32.xlu0 %v252_v41  ;;  %178 = vmin.xlane.f32.xlu1 %v177_v0  ;;  %v256_v41 = vcvt.f32.s32 %v718_v21 }
 0x108   :  { %193 = vmin.xlane.f32.xlu2 %v192_v9  ;;  %v182_v9 = vshll.u32 %v181_v19, 16 }
 0x109   :  { %v257_v47 = vshll.u32 %v256_v41, 16 }
 0x10b   :  { %v754_v26 = vpop.xlane.xlu2 %309 }
 0x10c   :  { %v733_v15 = vpop.xlane.xlu1 %294  ;;  %v735_v12 = vpop.xlane.xlu0 %234  ;;  %vm311_vm15 = vcmp.eq.f32.partialorder %v636_v29, %v754_v26  ;;  %v316_v5 = vcvt.f32.s32 %v754_v26 }
 0x10d   :  { %vm296_vm10 = vcmp.eq.f32.partialorder %v642_v35, %v733_v15  ;;  %vm236_vm11 = vcmp.eq.f32.partialorder %v638_v31, %v735_v12  ;;  %v337_v31 = vcvt.s32.f32 %v335_v59 }
 0x10e   :  { %v297_v54 = vsel %vm296_vm10, %v292_v32, inf  ;;  %v237_v20 = vsel %vm236_vm11, %v232_v37, inf }
 0x10f   :  { %298 = vmin.xlane.f32.xlu0 %v297_v54  ;;  %223 = vmin.xlane.f32.xlu1 %v222_v16  ;;  %v226_v16 = vcvt.f32.s32 %v714_v17 }
 0x110   :  { %238 = vmin.xlane.f32.xlu2 %v237_v20  ;;  %v241_v20 = vcvt.f32.s32 %v735_v12 }
 0x113   :  { %v764_v30 = vpop.xlane.xlu2 %354 }
 0x114   :  { %v746_v25 = vpop.xlane.xlu1 %339  ;;  %v748_v35 = vpop.xlane.xlu0 %279  ;;  %vm356_vm2 = vcmp.eq.f32.partialorder %v667_v45, %v764_v30  ;;  %v211_v45 = vcvt.f32.s32 %v703_v7  ;;  %v196_v7 = vcvt.f32.s32 %v720_v60  ;;  %v301_v60 = vcvt.f32.s32 %v733_v15 }
 0x115   :  { %vm341_vm13 = vcmp.eq.f32.partialorder %v671_v49, %v746_v25  ;;  %vm281_vm14 = vcmp.eq.f32.partialorder %v669_v46, %v748_v35  ;;  %v307_v49 = vcvt.s32.f32 %v305_v11  ;;  %v227_v15 = vshll.u32 %v226_v16, 16 }
 0x116   :  { %v342_v6 = vsel %vm341_vm13, %v337_v31, inf  ;;  %v282_v44 = vsel %vm281_vm14, %v277_v42, inf  ;;  %v212_v48 = vshll.u32 %v211_v45, 16  ;;  %v197_v21 = vshll.u32 %v196_v7, 16 }
 0x117   :  { %343 = vmin.xlane.f32.xlu0 %v342_v6  ;;  %268 = vmin.xlane.f32.xlu1 %v267_v36  ;;  %v312_v46 = vsel %vm311_vm15, %v307_v49, inf  ;;  %v302_v38 = vshll.u32 %v301_v60, 16  ;;  %v242_v42 = vshll.u32 %v241_v20, 16  ;;  %v271_v11 = vcvt.f32.s32 %v729_v28 }
 0x118   :  { %283 = vmin.xlane.f32.xlu2 %v282_v44  ;;  %v346_v52 = vcvt.f32.s32 %v746_v25  ;;  %v286_v49 = vcvt.f32.s32 %v748_v35 }
 0x119   :  { %v272_v25 = vshll.u32 %v271_v11, 16 }
 0x11c   :  { %v760_v53 = vpop.xlane.xlu0 %324 }
 0x11d   :  { %vm326_vm1 = vcmp.eq.f32.partialorder %v684_v56, %v760_v53  ;;  %v357_v56 = vsel %vm356_vm2, %v352_v2, inf  ;;  %v287_v2 = vshll.u32 %v286_v49, 16 }
 0x11e   :  { %v327_v61 = vsel %vm326_vm1, %v322_v55, inf }
 0x11f   :  { %313 = vmin.xlane.f32.xlu1 %v312_v46  ;;  %v347_v46 = vshll.u32 %v346_v52, 16 }
 0x120   :  { %328 = vmin.xlane.f32.xlu2 %v327_v61 }
 0x124   :  { %v770_v29 = vpop.xlane.xlu0 %369 }
 0x125   :  { %vm371_vm3 = vcmp.eq.f32.partialorder %v691_v62, %v770_v29 }
 0x126   :  { %v372_v4 = vsel %vm371_vm3, %v367_v33, inf }
 0x127   :  { %358 = vmin.xlane.f32.xlu1 %v357_v56 }
 0x128   :  { %373 = vmin.xlane.f32.xlu2 %v372_v4 }
 0x16a   :  { %v149_v10 = vpop.xlane.xlu2 %148 }
 0x16b   :  { %v150_v43 = vcvt.f32.s32 %v149_v10  ;;  %v331_v10 = vcvt.f32.s32 %v760_v53  ;;  %v361_v53 = vcvt.f32.s32 %v764_v30 }
 0x16d   :  { %v153_v57 = vadd.s32 %v152_v39, %v150_v43  ;;  %v317_v43 = vshll.u32 %v316_v5, 16  ;;  %v332_v45 = vshll.u32 %v331_v10, 16 }
 0x16f   :  { %380 = vst.msk [vmem:[%s855_s1] sm:$0xff] %vm379_vm4, %v153_v57 }
 0x172   :  { %v164_v62 = vpop.xlane.xlu1 %163  ;;  %v209_v13 = vpop.xlane.xlu0 %208 }
 0x173   :  { %v165_v14 = vcvt.f32.s32 %v164_v62  ;;  %v210_v63 = vcvt.f32.s32 %v209_v13 }
 0x175   :  { %v168_v1 = vadd.s32 %v167_v58, %v165_v14  ;;  %v213_v18 = vadd.s32 %v212_v48, %v210_v63  ;;  %v376_v48 = vcvt.f32.s32 %v770_v29  ;;  %v362_v14 = vshll.u32 %v361_v53, 16 }
 0x177   :  { %381 = vst.msk [vmem:[%s855_s1 + $0x8] sm:$0xff] %vm379_vm4, %v168_v1 }
 0x178   :  { %384 = vst.msk [vmem:[%s855_s1 + $0x20] sm:$0xff] %vm379_vm4, %v213_v18  ;;  %v377_v18 = vshll.u32 %v376_v48, 16 }
 0x17a   :  { %v179_v8 = vpop.xlane.xlu1 %178  ;;  %v254_v0 = vpop.xlane.xlu0 %253 }
 0x17b   :  { %v180_v23 = vcvt.f32.s32 %v179_v8  ;;  %v194_v3 = vpop.xlane.xlu2 %193  ;;  %v255_v27 = vcvt.f32.s32 %v254_v0 }
 0x17c   :  { %v195_v32 = vcvt.f32.s32 %v194_v3 }
 0x17d   :  { %v183_v34 = vadd.s32 %v182_v9, %v180_v23  ;;  %v258_v37 = vadd.s32 %v257_v47, %v255_v27 }
 0x17e   :  { %v198_v54 = vadd.s32 %v197_v21, %v195_v32 }
 0x17f   :  { %382 = vst.msk [vmem:[%s855_s1 + $0x10] sm:$0xff] %vm379_vm4, %v183_v34 }
 0x180   :  { %383 = vst.msk [vmem:[%s855_s1 + $0x18] sm:$0xff] %vm379_vm4, %v198_v54 }
 0x181   :  { %387 = vst.msk [vmem:[%s855_s1 + $0x38] sm:$0xff] %vm379_vm4, %v258_v37 }
 0x182   :  { %v224_v17 = vpop.xlane.xlu1 %223  ;;  %v299_v59 = vpop.xlane.xlu0 %298 }
 0x183   :  { %v225_v24 = vcvt.f32.s32 %v224_v17  ;;  %v239_v31 = vpop.xlane.xlu2 %238  ;;  %v300_v40 = vcvt.f32.s32 %v299_v59 }
 0x184   :  { %v240_v6 = vcvt.f32.s32 %v239_v31 }
 0x185   :  { %v228_v12 = vadd.s32 %v227_v15, %v225_v24  ;;  %v303_v36 = vadd.s32 %v302_v38, %v300_v40 }
 0x186   :  { %v243_v44 = vadd.s32 %v242_v42, %v240_v6 }
 0x187   :  { %385 = vst.msk [vmem:[%s855_s1 + $0x28] sm:$0xff] %vm379_vm4, %v228_v12 }
 0x188   :  { %386 = vst.msk [vmem:[%s855_s1 + $0x30] sm:$0xff] %vm379_vm4, %v243_v44 }
 0x189   :  { %390 = vst.msk [vmem:[%s855_s1 + $0x50] sm:$0xff] %vm379_vm4, %v303_v36 }
 0x18a   :  { %v269_v28 = vpop.xlane.xlu1 %268  ;;  %v344_v55 = vpop.xlane.xlu0 %343 }
 0x18b   :  { %v270_v61 = vcvt.f32.s32 %v269_v28  ;;  %v284_v22 = vpop.xlane.xlu2 %283  ;;  %v345_v51 = vcvt.f32.s32 %v344_v55 }
 0x18c   :  { %v285_v33 = vcvt.f32.s32 %v284_v22 }
 0x18d   :  { %v273_v35 = vadd.s32 %v272_v25, %v270_v61  ;;  %v348_v56 = vadd.s32 %v347_v46, %v345_v51 }
 0x18e   :  { %v288_v4 = vadd.s32 %v287_v2, %v285_v33 }
 0x18f   :  { %388 = vst.msk [vmem:[%s855_s1 + $0x40] sm:$0xff] %vm379_vm4, %v273_v35 }
 0x190   :  { %389 = vst.msk [vmem:[%s855_s1 + $0x48] sm:$0xff] %vm379_vm4, %v288_v4 }
 0x191   :  { %393 = vst.msk [vmem:[%s855_s1 + $0x68] sm:$0xff] %vm379_vm4, %v348_v56 }
 0x192   :  { %v314_v39 = vpop.xlane.xlu1 %313 }
 0x193   :  { %v315_v26 = vcvt.f32.s32 %v314_v39  ;;  %v329_v57 = vpop.xlane.xlu2 %328 }
 0x194   :  { %v330_v50 = vcvt.f32.s32 %v329_v57 }
 0x195   :  { %v318_v62 = vadd.s32 %v317_v43, %v315_v26 }
 0x196   :  { %v333_v13 = vadd.s32 %v332_v45, %v330_v50 }
 0x197   :  { %391 = vst.msk [vmem:[%s855_s1 + $0x58] sm:$0xff] %vm379_vm4, %v318_v62 }
 0x198   :  { %392 = vst.msk [vmem:[%s855_s1 + $0x60] sm:$0xff] %vm379_vm4, %v333_v13 }
 0x19a   :  { %v359_v58 = vpop.xlane.xlu1 %358 }
 0x19b   :  { %v360_v63 = vcvt.f32.s32 %v359_v58  ;;  %v374_v1 = vpop.xlane.xlu2 %373 }
 0x19c   :  { %v375_v19 = vcvt.f32.s32 %v374_v1 }
 0x19d   :  { %v363_v41 = vadd.s32 %v362_v14, %v360_v63 }
 0x19e   :  { %v378_v30 = vadd.s32 %v377_v18, %v375_v19 }
 0x19f   :  { %394 = vst.msk [vmem:[%s855_s1 + $0x70] sm:$0xff] %vm379_vm4, %v363_v41 }
 0x1a0   :  { %395 = vst.msk [vmem:[%s855_s1 + $0x78] sm:$0xff] %vm379_vm4, %v378_v30 }

</bundles_post_ra>
